<compile_context>
chip_gen: v7x
topology: tpu7x:2x2x1
jax: 0.10.0
libtpu: 0.0.40
codegen_flags: <defaults>
</compile_context>

<pallas_src>
import math

import jax
import jax.numpy as jnp
from jax.experimental import pallas as pl
from jax.experimental.pallas import tpu as pltpu


def _round_up(n: int, m: int) -> int:
    return pl.cdiv(n, m) * m


def _temperature_predictor_kernel(
    x_ref, w1_ref, b1_ref, w2_ref, b2_ref, w3_ref, b3_ref, out_ref
):
    # shared[0..2]: Linear(embed, hidden) + ReLU  (Dropout identity at eval)
    h = jnp.dot(x_ref[...], w1_ref[...], preferred_element_type=jnp.float32)
    h = jnp.maximum(h + b1_ref[...], 0.0)

    # shared[3..5]: Linear(hidden, hidden) + ReLU
    h = jnp.dot(h.astype(w2_ref.dtype), w2_ref[...], preferred_element_type=jnp.float32)
    h = jnp.maximum(h + b2_ref[...], 0.0)

    # forecast_head: Linear(hidden, output_dim * horizon)
    y = jnp.dot(h.astype(w3_ref.dtype), w3_ref[...], preferred_element_type=jnp.float32)
    out_ref[...] = (y + b3_ref[...]).astype(out_ref.dtype)


def _pad2(a, rows, cols):
    """Zero-pad a 2D array up to (rows, cols)."""
    r, c = a.shape
    if r == rows and c == cols:
        return a
    return jnp.pad(a, ((0, rows - r), (0, cols - c)))


def _vmem_ceiling_and_tile_cap():
    """Per-generation scoped-VMEM ceiling and batch-tile cap."""
    try:
        cap = int(pltpu.get_tpu_info().vmem_capacity_bytes)
    except Exception:
        cap = 64 * 1024 * 1024  # conservative fallback (v7x per-TC size)
    if cap <= 64 * 1024 * 1024:
        # v7x-class: 64 MiB physical -> leave headroom for Mosaic internal scratch.
        return 40 * 1024 * 1024, 512
    # v5e / v6e: 128 MiB physical -> fatter tiles amortize the ~0.35us per-step overhead.
    return 64 * 1024 * 1024, 2048


def _pick_batch_tile(batch, per_row_bytes, weight_bytes, vmem_ceiling, tile_cap, align):
    """Largest aligned batch tile whose working set fits (ceiling - resident weights)."""
    budget = vmem_ceiling - weight_bytes - (4 << 20)  # 4 MiB headroom
    tb = budget // max(per_row_bytes, 1)
    tb = (tb // align) * align
    tb = max(align, min(tile_cap, tb))
    tb = min(tb, _round_up(batch, align))
    return int(tb)


def temperature_predictor_forward(
    x,
    params,
    horizon,
    output_dim,
    *,
    compute_dtype=jnp.bfloat16,
    out_dtype=jnp.float32,
    batch_tile=None,
    core_parallel=False,
):
    """Fused predictor forward.

    Args:
      x: [batch, embed_dim] float array.
      params: dict with w1,b1,w2,b2,w3,b3 ([in,out] weight layout, [1,out] bias), f32.
      horizon, output_dim: reshape targets for the forecast.
      compute_dtype: dtype fed to the MXU (bf16 recommended); accumulation is f32.
        NOTE: bf16 intentionally deviates slightly from the f32 PyTorch reference.
      out_dtype: dtype stored to HBM for the output (f32 default for parity; bf16 halves
        store traffic when acceptable).
      batch_tile: optional override for the batch tile size.
      core_parallel: opt-in pltpu.CORE_PARALLEL on the batch grid axis (v7x 2-TC split).

    Returns:
      forecast: [batch, horizon, output_dim] of out_dtype.
    """
    batch, embed_dim = x.shape
    hidden_dim = params["w1"].shape[1]
    out_flat = horizon * output_dim
    in_bytes = jnp.dtype(compute_dtype).itemsize
    out_bytes = jnp.dtype(out_dtype).itemsize

    # Lane-dense (multiple-of-128) feature dims for the matmul K/N axes; zero padding keeps
    # the math exact.  The output (N of the last matmul) is left UNPADDED when out_flat < 128
    # (full-extent BlockSpec exception) so we don't write 4x padded bytes per row.
    e_pad = _round_up(embed_dim, 128)
    h_pad = _round_up(hidden_dim, 128)
    if out_flat % 128 == 0 or out_flat < 128:
        o_pad = out_flat
    else:
        o_pad = _round_up(out_flat, 128)

    w1 = _pad2(params["w1"], e_pad, h_pad).astype(compute_dtype)
    w2 = _pad2(params["w2"], h_pad, h_pad).astype(compute_dtype)
    w3 = _pad2(params["w3"], h_pad, o_pad).astype(compute_dtype)
    # Biases stay f32: bias add + ReLU happen on the f32 accumulator.
    b1 = _pad2(params["b1"], 1, h_pad).astype(jnp.float32)
    b2 = _pad2(params["b2"], 1, h_pad).astype(jnp.float32)
    b3 = _pad2(params["b3"], 1, o_pad).astype(jnp.float32)

    vmem_ceiling, tile_cap = _vmem_ceiling_and_tile_cap()

    # Single-buffered (Buffered(1)) resident weights + f32 biases.
    w_bytes = (e_pad * h_pad + h_pad * h_pad + h_pad * o_pad) * in_bytes \
        + (2 * h_pad + o_pad) * 4
    if w_bytes > int(0.75 * vmem_ceiling):
        # TODO(synk): implement a hidden-dim (K/N) grid-tiled fallback (f32 accumulator
        # scratch + pl.when init/finalize) instead of fully-resident weights for very large
        # hidden_dim on v7x's 64 MiB VMEM.
        raise ValueError(
            f"Resident weights ({w_bytes} B) exceed the VMEM budget "
            f"({vmem_ceiling} B); hidden-dim tiling fallback not implemented."
        )

    # Per-row VMEM: double-buffered x/out blocks, two f32 h intermediates, f32 y, and the
    # bf16 recast copies of h fed to the 2nd/3rd matmuls (absent on the f32 path).
    recast_bytes = 0 if compute_dtype == jnp.float32 else 2 * h_pad * in_bytes
    per_row = (2 * e_pad * in_bytes + 2 * o_pad * out_bytes
               + 2 * h_pad * 4 + o_pad * 4 + recast_bytes)

    # bf16 packs 16 rows per sublane group; keep bf16 tiles 16-aligned (32 for 8-bit).
    align = 8 if in_bytes >= 4 else (16 if in_bytes == 2 else 32)

    if batch_tile is not None:
        tb = max(align, (int(batch_tile) // align) * align)
    else:
        tb = _pick_batch_tile(batch, per_row, w_bytes, vmem_ceiling, tile_cap, align)
    batch_pad = _round_up(batch, tb)

    # Skip the host-side pad copy entirely when shapes are already aligned.
    x = x.astype(compute_dtype)
    if batch_pad == batch and e_pad == embed_dim:
        xp = x
    else:
        xp = jnp.pad(x, ((0, batch_pad - batch), (0, e_pad - embed_dim)))

    vmem_limit = int(min(vmem_ceiling,
                         max(16 * 1024 * 1024, w_bytes + tb * per_row + (4 << 20))))

    grid = (batch_pad // tb,)
    if core_parallel and grid[0] >= 2 and grid[0] % 2 == 0:
        # Explicit 2-TensorCore split of the batch axis (v7x megacore).
        dim_sem = (pltpu.CORE_PARALLEL,)
    else:
        dim_sem = ("parallel",)

    cost = pl.CostEstimate(
        flops=2 * batch_pad * (e_pad * h_pad + h_pad * h_pad + h_pad * o_pad),
        transcendentals=0,
        bytes_accessed=batch_pad * e_pad * in_bytes + w_bytes
        + batch_pad * o_pad * out_bytes,
    )

    const_map = lambda i: (0, 0)
    resident = pl.Buffered(1)  # revisited with the same block index -> no double-buffer

    flat = pl.pallas_call(
        _temperature_predictor_kernel,
        out_shape=jax.ShapeDtypeStruct((batch_pad, o_pad), out_dtype),
        grid=grid,
        in_specs=[
            pl.BlockSpec((tb, e_pad), lambda i: (i, 0)),  # x: moves with the batch tile
            pl.BlockSpec((e_pad, h_pad), const_map, pipeline_mode=resident),
            pl.BlockSpec((1, h_pad), const_map, pipeline_mode=resident),
            pl.BlockSpec((h_pad, h_pad), const_map, pipeline_mode=resident),
            pl.BlockSpec((1, h_pad), const_map, pipeline_mode=resident),
            pl.BlockSpec((h_pad, o_pad), const_map, pipeline_mode=resident),
            pl.BlockSpec((1, o_pad), const_map, pipeline_mode=resident),
        ],
        out_specs=pl.BlockSpec((tb, o_pad), lambda i: (i, 0)),
        compiler_params=pltpu.CompilerParams(
            dimension_semantics=dim_sem,
            vmem_limit_bytes=vmem_limit,
        ),
        cost_estimate=cost,
    )(xp, w1, b1, w2, b2, w3, b3)

    # Strip padding; glue matches torch `forecast.view(-1, horizon, output_dim)`.
    return flat[:batch, :out_flat].reshape(batch, horizon, output_dim)


def init_params(key, embed_dim, hidden_dim, output_dim, horizon):
    """Deterministic init mimicking nn.Linear's uniform(-1/sqrt(fan_in), +1/sqrt(fan_in))."""
    def linear(k, fan_in, fan_out):
        kw, kb = jax.random.split(k)
        bound = 1.0 / math.sqrt(fan_in)
        w = jax.random.uniform(kw, (fan_in, fan_out), jnp.float32, -bound, bound)
        b = jax.random.uniform(kb, (1, fan_out), jnp.float32, -bound, bound)
        return w, b

    k1, k2, k3 = jax.random.split(key, 3)
    w1, b1 = linear(k1, embed_dim, hidden_dim)
    w2, b2 = linear(k2, hidden_dim, hidden_dim)
    w3, b3 = linear(k3, hidden_dim, output_dim * horizon)
    return {"w1": w1, "b1": b1, "w2": w2, "b2": b2, "w3": w3, "b3": b3}


def reference_forward(x, params, horizon, output_dim):
    """Pure-JAX f32 reference of the PyTorch forward (eval mode, uncertainty_type='none')."""
    h = jnp.maximum(x @ params["w1"] + params["b1"], 0.0)
    h = jnp.maximum(h @ params["w2"] + params["b2"], 0.0)
    y = h @ params["w3"] + params["b3"]
    return y.reshape(-1, horizon, output_dim)


if __name__ == "__main__":
    # Small shapes consistent with the module's forward: x is [batch, embed_dim].
    batch = 2
    embed_dim = 32
    hidden_dim = 32
    output_dim = 4
    horizon = 8

    key = jax.random.PRNGKey(0)
    k_params, k_x = jax.random.split(key)

    params = init_params(k_params, embed_dim, hidden_dim, output_dim, horizon)
    x = jax.random.normal(k_x, (batch, embed_dim), jnp.float32)

    ref = reference_forward(x, params, horizon, output_dim)

    # 1) f32 compute path: bit-accurate check against the reference.
    forecast_f32 = temperature_predictor_forward(
        x, params, horizon, output_dim, compute_dtype=jnp.float32
    )
    forecast_f32 = jax.block_until_ready(forecast_f32)
    assert forecast_f32.shape == (batch, horizon, output_dim)
    assert jnp.allclose(forecast_f32, ref, atol=1e-5, rtol=1e-5)

    # 2) bf16 compute path (the optimized deployment path): f32 accumulation, loose tolerance.
    forecast_bf16 = temperature_predictor_forward(
        x, params, horizon, output_dim, compute_dtype=jnp.bfloat16
    )
    forecast_bf16 = jax.block_until_ready(forecast_bf16)
    assert forecast_bf16.shape == (batch, horizon, output_dim)
    assert jnp.allclose(forecast_bf16, ref, atol=5e-2, rtol=5e-2)

    # TODO(synk): heteroscedastic head (mean/logvar -> exp(var)) not exercised; default
    # uncertainty_type='none' path is implemented.  Dropout is identity in eval mode.
    print("KERNEL_OK")
</pallas_src>

<mosaic_0001>
module attributes {stable_mosaic.version = 11 : i64} {
  func.func @_temperature_predictor_kernel(%arg0: i32, %arg1: memref<8x128xf32, #tpu.memory_space<vmem>>, %arg2: memref<128x128xf32, #tpu.memory_space<vmem>>, %arg3: memref<1x128xf32, #tpu.memory_space<vmem>>, %arg4: memref<128x128xf32, #tpu.memory_space<vmem>>, %arg5: memref<1x128xf32, #tpu.memory_space<vmem>>, %arg6: memref<128x32xf32, #tpu.memory_space<vmem>>, %arg7: memref<1x32xf32, #tpu.memory_space<vmem>>, %arg8: memref<8x32xf32, #tpu.memory_space<vmem>>) attributes {dimension_semantics = [#tpu.dimension_semantics<parallel>], iteration_bounds = array<i64: 1>, scalar_prefetch = 0 : i64, scratch_operands = 0 : i64, tpu.core_type = #tpu.core_type<tc>, window_params = [{transform_indices = @transform_0, window_bounds = array<i64: 8, 128>}, {pipeline_mode = #tpu.pipeline_mode<synchronous>, transform_indices = @transform_1, window_bounds = array<i64: 128, 128>}, {pipeline_mode = #tpu.pipeline_mode<synchronous>, transform_indices = @transform_2, window_bounds = array<i64: 1, 128>}, {pipeline_mode = #tpu.pipeline_mode<synchronous>, transform_indices = @transform_3, window_bounds = array<i64: 128, 128>}, {pipeline_mode = #tpu.pipeline_mode<synchronous>, transform_indices = @transform_4, window_bounds = array<i64: 1, 128>}, {pipeline_mode = #tpu.pipeline_mode<synchronous>, transform_indices = @transform_5, window_bounds = array<i64: 128, 32>}, {pipeline_mode = #tpu.pipeline_mode<synchronous>, transform_indices = @transform_6, window_bounds = array<i64: 1, 32>}, {transform_indices = @transform_7, window_bounds = array<i64: 8, 32>}]} {
    %c0 = arith.constant 0 : index
    %c0_0 = arith.constant 0 : index
    %0 = vector.load %arg1[%c0, %c0_0] : memref<8x128xf32, #tpu.memory_space<vmem>>, vector<8x128xf32>
    %c0_1 = arith.constant 0 : index
    %c0_2 = arith.constant 0 : index
    %1 = vector.load %arg2[%c0_1, %c0_2] : memref<128x128xf32, #tpu.memory_space<vmem>>, vector<128x128xf32>
    %cst = arith.constant dense<0.000000e+00> : vector<8x128xf32>
    %2 = tpu.matmul %0, %1, %cst {dimension_numbers = #tpu.dot_dimension_numbers<[1], [0], [0], [1], [0, 0, 1, 1], [], []>} : vector<8x128xf32>, vector<128x128xf32>, vector<8x128xf32> -> vector<8x128xf32>
    %c0_3 = arith.constant 0 : index
    %c0_4 = arith.constant 0 : index
    %3 = vector.load %arg3[%c0_3, %c0_4] : memref<1x128xf32, #tpu.memory_space<vmem>>, vector<1x128xf32>
    %4 = vector.broadcast %3 : vector<1x128xf32> to vector<8x128xf32>
    %5 = arith.addf %2, %4 : vector<8x128xf32>
    %cst_5 = arith.constant 0.000000e+00 : f32
    %6 = vector.broadcast %cst_5 : f32 to vector<8x128xf32>
    %7 = arith.maximumf %5, %6 : vector<8x128xf32>
    %c0_6 = arith.constant 0 : index
    %c0_7 = arith.constant 0 : index
    %8 = vector.load %arg4[%c0_6, %c0_7] : memref<128x128xf32, #tpu.memory_space<vmem>>, vector<128x128xf32>
    %cst_8 = arith.constant dense<0.000000e+00> : vector<8x128xf32>
    %9 = tpu.matmul %7, %8, %cst_8 {dimension_numbers = #tpu.dot_dimension_numbers<[1], [0], [0], [1], [0, 0, 1, 1], [], []>} : vector<8x128xf32>, vector<128x128xf32>, vector<8x128xf32> -> vector<8x128xf32>
    %c0_9 = arith.constant 0 : index
    %c0_10 = arith.constant 0 : index
    %10 = vector.load %arg5[%c0_9, %c0_10] : memref<1x128xf32, #tpu.memory_space<vmem>>, vector<1x128xf32>
    %11 = vector.broadcast %10 : vector<1x128xf32> to vector<8x128xf32>
    %12 = arith.addf %9, %11 : vector<8x128xf32>
    %cst_11 = arith.constant 0.000000e+00 : f32
    %13 = vector.broadcast %cst_11 : f32 to vector<8x128xf32>
    %14 = arith.maximumf %12, %13 : vector<8x128xf32>
    %c0_12 = arith.constant 0 : index
    %c0_13 = arith.constant 0 : index
    %15 = vector.load %arg6[%c0_12, %c0_13] : memref<128x32xf32, #tpu.memory_space<vmem>>, vector<128x32xf32>
    %cst_14 = arith.constant dense<0.000000e+00> : vector<8x32xf32>
    %16 = tpu.matmul %14, %15, %cst_14 {dimension_numbers = #tpu.dot_dimension_numbers<[1], [0], [0], [1], [0, 0, 1, 1], [], []>} : vector<8x128xf32>, vector<128x32xf32>, vector<8x32xf32> -> vector<8x32xf32>
    %c0_15 = arith.constant 0 : index
    %c0_16 = arith.constant 0 : index
    %17 = vector.load %arg7[%c0_15, %c0_16] : memref<1x32xf32, #tpu.memory_space<vmem>>, vector<1x32xf32>
    %18 = vector.broadcast %17 : vector<1x32xf32> to vector<8x32xf32>
    %19 = arith.addf %16, %18 : vector<8x32xf32>
    %c0_17 = arith.constant 0 : index
    %c0_18 = arith.constant 0 : index
    %20 = vector.load %arg8[%c0_17, %c0_18] : memref<8x32xf32, #tpu.memory_space<vmem>>, vector<8x32xf32>
    tpu.vector_store %arg8[%c0_17, %c0_18], %19 {strides = array<i32>} : memref<8x32xf32, #tpu.memory_space<vmem>>, vector<8x32xf32>,
    return
  }
  func.func @transform_0(%arg0: i32) -> (i32, i32) {
    %c0_i32 = arith.constant 0 : i32
    %c0_i32_0 = arith.constant 0 : i32
    return %arg0, %c0_i32 : i32, i32
  }
  func.func @transform_1(%arg0: i32) -> (i32, i32) {
    %c0_i32 = arith.constant 0 : i32
    %c0_i32_0 = arith.constant 0 : i32
    %c0_i32_1 = arith.constant 0 : i32
    return %c0_i32, %c0_i32_0 : i32, i32
  }
  func.func @transform_2(%arg0: i32) -> (i32, i32) {
    %c0_i32 = arith.constant 0 : i32
    %c0_i32_0 = arith.constant 0 : i32
    %c0_i32_1 = arith.constant 0 : i32
    return %c0_i32, %c0_i32_0 : i32, i32
  }
  func.func @transform_3(%arg0: i32) -> (i32, i32) {
    %c0_i32 = arith.constant 0 : i32
    %c0_i32_0 = arith.constant 0 : i32
    %c0_i32_1 = arith.constant 0 : i32
    return %c0_i32, %c0_i32_0 : i32, i32
  }
  func.func @transform_4(%arg0: i32) -> (i32, i32) {
    %c0_i32 = arith.constant 0 : i32
    %c0_i32_0 = arith.constant 0 : i32
    %c0_i32_1 = arith.constant 0 : i32
    return %c0_i32, %c0_i32_0 : i32, i32
  }
  func.func @transform_5(%arg0: i32) -> (i32, i32) {
    %c0_i32 = arith.constant 0 : i32
    %c0_i32_0 = arith.constant 0 : i32
    %c0_i32_1 = arith.constant 0 : i32
    return %c0_i32, %c0_i32_0 : i32, i32
  }
  func.func @transform_6(%arg0: i32) -> (i32, i32) {
    %c0_i32 = arith.constant 0 : i32
    %c0_i32_0 = arith.constant 0 : i32
    %c0_i32_1 = arith.constant 0 : i32
    return %c0_i32, %c0_i32_0 : i32, i32
  }
  func.func @transform_7(%arg0: i32) -> (i32, i32) {
    %c0_i32 = arith.constant 0 : i32
    %c0_i32_0 = arith.constant 0 : i32
    return %arg0, %c0_i32 : i32, i32
  }
}

</mosaic_0001>

<bundles_post_ra>
// kernel: tpu_custom_call.1
= control target key start
LH: loop header
LB: loop body
LE: loop exit
PB: predicated region body
PF: predicated region fallthrough
CT: control target
= control target key end

     0   :  { %12 = vsyncpa [#allocation3], 0  ;;  %s835_s0 = inlined_call_operand.vmem [shape: f32[8,128], index: 0, kind: input, shape index: {}]   ;;  %s836_s1 = inlined_call_operand.vmem [shape: f32[128,128], index: 1, kind: input, shape index: {}]   ;;  %s837_s2 = inlined_call_operand.vmem [shape: f32[1,128], index: 2, kind: input, shape index: {}]   ;;  %s838_s3 = inlined_call_operand.hbm [shape: f32[128,128], index: 3, kind: input, shape index: {}]   ;;  %s839_s4 = inlined_call_operand.vmem [shape: f32[1,128], index: 4, kind: input, shape index: {}]   ;;  %s840_s5 = inlined_call_operand.vmem [shape: f32[128,32], index: 5, kind: input, shape index: {}]   ;;  %s841_s6 = inlined_call_operand.vmem [shape: f32[1,32], index: 6, kind: input, shape index: {}]   ;;  %s842_s7 = inlined_call_operand.hbm [shape: f32[8,32], index: 7, kind: output, shape index: {}]  }
   0x1   :  { %13 = vsyncpa [#allocation4], 0  ;;  %s626_s24 = smov [#allocation2]   ;;  %s578_s28 = scalar_lea.hbm %s838_s3, 2048 }
   0x2   :  { %s25_s25 = sshll.u32 %s626_s24, 4  ;;  %p579_p0 = scmp.ne.s32.totalorder %s838_s3, %s578_s28  ;;  %s26_s25 = int_to_ptr.vmem [resolvable:$true] %s25_s25 }
   0x3   :  { %p582_p1 = scmp.lt.u32.totalorder %s578_s28, %s838_s3 }
   0x5   :  { %p584_p2 = pnand %p582_p1, %p579_p0 }
   0x7   :  { %587 = shalt.err (!%p584_p2)
}
   0x8   :  { %s588_s10 = scalar_lea.vmem %s26_s25, 2048  ;;  %p593_p4 = scmp.lt.s32.totalorder %s26_s25, %s26_s25 }
   0x9   :  { %p589_p3 = scmp.ne.s32.totalorder %s26_s25, %s588_s10  ;;  %p594_p5 = scmp.lt.s32.totalorder %s588_s10, %s588_s10 }
   0xb   :  { %p595_p6 = por %p594_p5, %p593_p4 }
   0xd   :  { %p596_p7 = pnand %p595_p6, %p589_p3 }
   0xf   :  { %599 = shalt.err (!%p596_p7)
}
  0x10   :  { %s627_s11 = smov 128   ;;  %s628_s12 = smov 8  }
  0x11   :  { %31 = dma.hbm_to_vmem [thread:$0]  %s838_s3, 2048, %s26_s25, [#allocation3], %s627_s11, %s627_s11, %s628_s12  }
  0x12   :  { %622 = dma.done.wait [#allocation3], 2048  }
  0x13   :  { %623 = vsyncadd [#allocation3], 4294965248  ;;  %v629_v0 = vmov 0.0|0.0   ;;  %vm630_vm0 = vmmov 0   ;;  %v631_v1 = vmov 0.0   ;;  %v42_v2 = vld [vmem:[%s836_s1] sm:$0xff] }
  0x14   :  { %499 = vmatprep.subr.bf16.mxu0 %v629_v0  ;;  %426 = vmatprep.mubr.msk.f32.mxu0 %vm630_vm0, %v631_v1  ;;  %v43_v3 = vld [vmem:[%s836_s1 + $0x8] sm:$0xff]  ;;  %v44_v4 = vld [vmem:[%s836_s1 + $0x10] sm:$0xff]  ;;  %v45_v6 = vld [vmem:[%s836_s1 + $0x18] sm:$0xff]  ;;  %s632_s10 = smov [#allocation5]   ;;  %vm323_vm1 = vcmask 261120  }
  0x15   :  { %523 = vmatprep.subr.bf16.mxu1 %v629_v0  ;;  %461 = vmatprep.mubr.msk.f32.mxu1 %vm630_vm0, %v631_v1  ;;  %v500_v5 = vpack.c.bf16 %v43_v3, %v42_v2  ;;  %v503_v7 = vpack.c.bf16 %v45_v6, %v44_v4  ;;  %v46_v8 = vld [vmem:[%s836_s1 + $0x20] sm:$0xff]  ;;  %v47_v9 = vld [vmem:[%s836_s1 + $0x28] sm:$0xff]  ;;  %v138_v12 = vld [vmem:[#allocation2 + $0x10] sm:$0xff]  ;;  %s331_s11 = sshll.u32 %s632_s10, 4  ;;  %s332_s11 = int_to_ptr.vmem [resolvable:$true] %s331_s11 }
  0x16   :  { %v136_v10 = vld [vmem:[#allocation2] sm:$0xff]  ;;  %v137_v11 = vld [vmem:[#allocation2 + $0x8] sm:$0xff]  ;;  %v139_v13 = vld [vmem:[#allocation2 + $0x18] sm:$0xff]  ;;  %v506_v14 = vpack.c.bf16 %v47_v9, %v46_v8  ;;  %p605_p9 = scmp.lt.s32.totalorder %s332_s11, %s332_s11 }
  0x17   :  { %501 = vmatpush3.bf16.msra.mxu0 %v500_v5  ;;  %v524_v15 = vpack.c.bf16 %v137_v11, %v136_v10  ;;  %v48_v16 = vld [vmem:[%s836_s1 + $0x30] sm:$0xff]  ;;  %v49_v17 = vld [vmem:[%s836_s1 + $0x38] sm:$0xff]  ;;  %v527_v18 = vpack.c.bf16 %v139_v13, %v138_v12  ;;  %v140_v19 = vld [vmem:[#allocation2 + $0x20] sm:$0xff] }
  0x18   :  { %502 = vmatprep.subr.bf16.mxu0 %v629_v0  ;;  %v141_v20 = vld [vmem:[#allocation2 + $0x28] sm:$0xff]  ;;  %v509_v21 = vpack.c.bf16 %v49_v17, %v48_v16  ;;  %v50_v22 = vld [vmem:[%s836_s1 + $0x40] sm:$0xff]  ;;  %v142_v25 = vld [vmem:[#allocation2 + $0x30] sm:$0xff] }
  0x19   :  { %525 = vmatpush3.bf16.msra.mxu1 %v524_v15  ;;  %v51_v23 = vld [vmem:[%s836_s1 + $0x48] sm:$0xff]  ;;  %v530_v24 = vpack.c.bf16 %v141_v20, %v140_v19  ;;  %v143_v26 = vld [vmem:[#allocation2 + $0x38] sm:$0xff]  ;;  %v52_v28 = vld [vmem:[%s836_s1 + $0x50] sm:$0xff] }
  0x1a   :  { %526 = vmatprep.subr.bf16.mxu1 %v629_v0  ;;  %v512_v27 = vpack.c.bf16 %v51_v23, %v50_v22  ;;  %v53_v29 = vld [vmem:[%s836_s1 + $0x58] sm:$0xff]  ;;  %v533_v30 = vpack.c.bf16 %v143_v26, %v142_v25  ;;  %v144_v31 = vld [vmem:[#allocation2 + $0x40] sm:$0xff]  ;;  %v145_v32 = vld [vmem:[#allocation2 + $0x48] sm:$0xff] }
  0x1b   :  { %504 = vmatpush3.bf16.msra.mxu0 %v503_v7  ;;  %v515_v33 = vpack.c.bf16 %v53_v29, %v52_v28  ;;  %v54_v34 = vld [vmem:[%s836_s1 + $0x60] sm:$0xff]  ;;  %v55_v35 = vld [vmem:[%s836_s1 + $0x68] sm:$0xff]  ;;  %v536_v36 = vpack.c.bf16 %v145_v32, %v144_v31  ;;  %v146_v37 = vld [vmem:[#allocation2 + $0x50] sm:$0xff] }
  0x1c   :  { %505 = vmatprep.subr.bf16.mxu0 %v629_v0  ;;  %v147_v38 = vld [vmem:[#allocation2 + $0x58] sm:$0xff]  ;;  %v518_v39 = vpack.c.bf16 %v55_v35, %v54_v34  ;;  %v56_v40 = vld [vmem:[%s836_s1 + $0x70] sm:$0xff]  ;;  %v148_v43 = vld [vmem:[#allocation2 + $0x60] sm:$0xff] }
  0x1d   :  { %528 = vmatpush3.bf16.msra.mxu1 %v527_v18  ;;  %v57_v41 = vld [vmem:[%s836_s1 + $0x78] sm:$0xff]  ;;  %v539_v42 = vpack.c.bf16 %v147_v38, %v146_v37  ;;  %v149_v44 = vld [vmem:[#allocation2 + $0x68] sm:$0xff]  ;;  %v41_v47 = vld [vmem:[%s835_s0] sm:$0xff] }
  0x1e   :  { %529 = vmatprep.subr.bf16.mxu1 %v629_v0  ;;  %v521_v45 = vpack.c.bf16 %v57_v41, %v56_v40  ;;  %v542_v46 = vpack.c.bf16 %v149_v44, %v148_v43  ;;  %v150_v48 = vld [vmem:[#allocation2 + $0x70] sm:$0xff]  ;;  %v151_v49 = vld [vmem:[#allocation2 + $0x78] sm:$0xff]  ;;  %v230_v51 = vld [vmem:[%s840_s5] sm:$0xff] }
  0x1f   :  { %507 = vmatpush3.bf16.msra.mxu0 %v506_v14  ;;  %v545_v50 = vpack.c.bf16 %v151_v49, %v150_v48  ;;  %v231_v52 = vld [vmem:[%s840_s5 + $0x8] sm:$0xff]  ;;  %v232_v53 = vld [vmem:[%s840_s5 + $0x10] sm:$0xff]  ;;  %v233_v55 = vld [vmem:[%s840_s5 + $0x18] sm:$0xff] }
  0x20   :  { %508 = vmatprep.subr.bf16.mxu0 %v629_v0  ;;  %v548_v54 = vpack.c.bf16 %v231_v52, %v230_v51  ;;  %v551_v56 = vpack.c.bf16 %v233_v55, %v232_v53  ;;  %v234_v57 = vld [vmem:[%s840_s5 + $0x20] sm:$0xff]  ;;  %v235_v58 = vld [vmem:[%s840_s5 + $0x28] sm:$0xff]  ;;  %v236_v60 = vld [vmem:[%s840_s5 + $0x30] sm:$0xff] }
  0x21   :  { %531 = vmatpush3.bf16.msra.mxu1 %v530_v24  ;;  %v554_v59 = vpack.c.bf16 %v235_v58, %v234_v57  ;;  %v237_v61 = vld [vmem:[%s840_s5 + $0x38] sm:$0xff]  ;;  %v238_v63 = vld [vmem:[%s840_s5 + $0x40] sm:$0xff]  ;;  %v240_v3 = vld [vmem:[%s840_s5 + $0x50] sm:$0xff] }
  0x22   :  { %532 = vmatprep.subr.bf16.mxu1 %v629_v0  ;;  %v557_v62 = vpack.c.bf16 %v237_v61, %v236_v60  ;;  %v241_v4 = vld [vmem:[%s840_s5 + $0x58] sm:$0xff]  ;;  %v242_v6 = vld [vmem:[%s840_s5 + $0x60] sm:$0xff]  ;;  %v243_v7 = vld [vmem:[%s840_s5 + $0x68] sm:$0xff] }
  0x23   :  { %510 = vmatpush3.bf16.msra.mxu0 %v509_v21  ;;  %v563_v5 = vpack.c.bf16 %v241_v4, %v240_v3  ;;  %v566_v8 = vpack.c.bf16 %v243_v7, %v242_v6  ;;  %v340_v9 = vld [vmem:[%s837_s2] ss:$0 sm:$0xff]  ;;  %v244_v14 = vld [vmem:[%s840_s5 + $0x70] sm:$0xff]  ;;  %v245_v15 = vld [vmem:[%s840_s5 + $0x78] sm:$0xff] }
  0x24   :  { %511 = vmatprep.subr.bf16.mxu0 %v629_v0  ;;  %v569_v16 = vpack.c.bf16 %v245_v15, %v244_v14  ;;  %v342_v21 = vld [vmem:[%s841_s6] ss:$0 sm:$0xff] }
  0x25   :  { %534 = vmatpush3.bf16.msra.mxu1 %v533_v30 }
  0x26   :  { %535 = vmatprep.subr.bf16.mxu1 %v629_v0 }
  0x27   :  { %513 = vmatpush3.bf16.msra.mxu0 %v512_v27 }
  0x28   :  { %514 = vmatprep.subr.bf16.mxu0 %v629_v0 }
  0x29   :  { %537 = vmatpush3.bf16.msra.mxu1 %v536_v36 }
  0x2a   :  { %538 = vmatprep.subr.bf16.mxu1 %v629_v0 }
  0x2b   :  { %516 = vmatpush3.bf16.msra.mxu0 %v515_v33 }
  0x2c   :  { %517 = vmatprep.subr.bf16.mxu0 %v629_v0 }
  0x2d   :  { %540 = vmatpush3.bf16.msra.mxu1 %v539_v42 }
  0x2e   :  { %541 = vmatprep.subr.bf16.mxu1 %v629_v0 }
  0x2f   :  { %519 = vmatpush3.bf16.msra.mxu0 %v518_v39 }
  0x30   :  { %520 = vmatprep.subr.bf16.mxu0 %v629_v0 }
  0x31   :  { %543 = vmatpush3.bf16.msra.mxu1 %v542_v46 }
  0x32   :  { %544 = vmatprep.subr.bf16.mxu1 %v629_v0 }
  0x33   :  { %522 = vmatpush3.bf16.msra.mxu0 %v521_v45 }
  0x34   :  { %547 = vmatprep.subr.bf16.mxu0 %v629_v0 }
  0x35   :  { %546 = vmatpush3.bf16.msra.mxu1 %v545_v50 }
  0x36   :  { %427 = vmatmul.mubr.f32.vlgmr.msra.gmra.mrb[0].mxu0 %v41_v47 }
  0x37   :  { %496 = vmatprep.mubr.msk.f32.mxu0 %vm630_vm0, %v631_v1  ;;  %549 = vmatpush3.bf16.msra.mxu0 %v548_v54  ;;  %v239_v1 = vld [vmem:[%s840_s5 + $0x48] sm:$0xff]  ;;  %s600_s5 = scalar_lea.vmem %s332_s11, 128 }
  0x38   :  { %550 = vmatprep.subr.bf16.mxu0 %v629_v0  ;;  %v560_v2 = vpack.c.bf16 %v239_v1, %v238_v63  ;;  %p601_p8 = scmp.ne.s32.totalorder %s332_s11, %s600_s5  ;;  %p606_p10 = scmp.lt.s32.totalorder %s600_s5, %s600_s5 }
  0x3a   :  { %p607_p11 = por %p606_p10, %p605_p9 }
  0x3b   :  { %552 = vmatpush3.bf16.msra.mxu0 %v551_v56 }
  0x3c   :  { %553 = vmatprep.subr.bf16.mxu0 %v629_v0  ;;  %p608_p12 = pnand %p607_p11, %p601_p8 }
  0x3f   :  { %555 = vmatpush3.bf16.msra.mxu0 %v554_v59 }
  0x40   :  { %556 = vmatprep.subr.bf16.mxu0 %v629_v0 }
  0x43   :  { %558 = vmatpush3.bf16.msra.mxu0 %v557_v62 }
  0x44   :  { %559 = vmatprep.subr.bf16.mxu0 %v629_v0 }
  0x47   :  { %561 = vmatpush3.bf16.msra.mxu0 %v560_v2 }
  0x48   :  { %562 = vmatprep.subr.bf16.mxu0 %v629_v0 }
  0x4b   :  { %564 = vmatpush3.bf16.msra.mxu0 %v563_v5 }
  0x4c   :  { %565 = vmatprep.subr.bf16.mxu0 %v629_v0 }
  0x4f   :  { %567 = vmatpush3.bf16.msra.mxu0 %v566_v8 }
  0x50   :  { %568 = vmatprep.subr.bf16.mxu0 %v629_v0  ;;  %v341_v0 = vld [vmem:[%s839_s4] ss:$0 sm:$0xff] }
  0x53   :  { %570 = vmatpush3.bf16.msra.mxu0 %v569_v16 }
 0x109   :  { %v131_v10 = vpop.f32.mrb[0].mxu0 }
 0x10a   :  { %v132_v11 = vadd.f32 %v340_v9, %v131_v10  ;;  %v428_v12 = vpop.f32.mrb[1].mxu0 }
 0x10c   :  { %v135_v13 = vmax.f32 %v132_v11, 0.0 }
 0x10e   :  { %462 = vmatmul.mubr.f32.vlgmr.msra.gmra.mrb[0].mxu1 %v135_v13 }
 0x1e1   :  { %v225_v17 = vpop.f32.mrb[0].mxu1 }
 0x1e2   :  { %v226_v18 = vadd.f32 %v341_v0, %v225_v17  ;;  %v463_v19 = vpop.f32.mrb[1].mxu1 }
 0x1e4   :  { %v229_v20 = vmax.f32 %v226_v18, 0.0 }
 0x1e6   :  { %497 = vmatmul.mubr.f32.vlgmr.msra.gmra.mrb[2].mxu0 %v229_v20 }
 0x2b9   :  { %v319_v22 = vpop.f32.mrb[2].mxu0 }
 0x2ba   :  { %v320_v23 = vadd.f32 %v342_v21, %v319_v22  ;;  %v498_v24 = vpop.f32.mrb[3].mxu0 }
 0x2bc   :  { %324 = vst.msk [vmem:[#allocation5] sm:$0xff] %vm323_vm1, %v320_v23 }
 0x2bd   :  { %611 = shalt.err (!%p608_p12)
}
 0x2be   :  { %s612_s13 = scalar_lea.hbm %s842_s7, 128 }
 0x2bf   :  { %p613_p13 = scmp.ne.s32.totalorder %s842_s7, %s612_s13  ;;  %p616_p0 = scmp.lt.u32.totalorder %s612_s13, %s842_s7 }
 0x2c1   :  { %p618_p1 = pnand %p616_p0, %p613_p13 }
 0x2c3   :  { %621 = shalt.err (!%p618_p1)
}
 0x2c4   :  { %334 = dma.vmem_to_hbm [thread:$0]  %s332_s11, 128, %s842_s7, [#allocation4]  }
 0x2c5   :  { %624 = dma.done.wait [#allocation4], 128  }
 0x2c6   :  { %625 = vsyncadd [#allocation4], 4294967168 }
 0x2c7   :  { %338 = vsyncpa [#allocation3], 1 }
 0x2c8   :  { %339 = vsyncpa [#allocation4], 1 }

</bundles_post_ra>
